<compile_context>
chip_gen: v5e
topology: v5e:2x2
jax: 0.10.0
libtpu: 0.0.40
codegen_flags: <defaults>
</compile_context>

<pallas_src>
import jax
import jax.numpy as jnp
from jax.experimental import pallas as pl
from jax.experimental.pallas import tpu as pltpu


def sim_based_loss(y_s, y_t, *, block_k=None):
    """Pallas implementation of SimBasedLoss.forward for y_s, y_t: [B, D].

    block_k: optional cap on the K (feature) tile width (rounded to a multiple
             of 128).  Default: derived from the VMEM budget (prefer whole D).
    """
    assert y_s.ndim == 2 and y_s.shape == y_t.shape, "expected matching [B, D]"
    assert y_s.dtype == y_t.dtype, "y_s / y_t dtypes must match"
    B, D = y_s.shape
    itemsize = jnp.dtype(y_s.dtype).itemsize

    # ---- VMEM budget (generation-aware; v7x has 64 MiB, v5e/v6e 128 MiB). ----
    try:
        vmem_cap = int(pltpu.get_tpu_info().vmem_capacity_bytes)
    except Exception:
        vmem_cap = 64 * 1024 * 1024  # conservative across generations
    budget = (vmem_cap * 3) // 4     # headroom for compiler-internal scratch

    gram_bytes = 2 * B * B * 4       # two f32 (B, B) accumulators

    def _fits(tk):
        # 2 inputs x 2 pipeline buffers x (B, tk) slabs + gram accumulators.
        return 2 * 2 * B * tk * itemsize + gram_bytes <= budget

    # ---- K-tile selection: whole-D single step when it fits, else the -------
    # ---- largest lane-aligned (multiple-of-128) slab that fits. -------------
    if block_k is not None and block_k < D:
        tk = max(128, (block_k // 128) * 128)
    elif _fits(D):
        tk = D
    else:
        max_tk = (budget - gram_bytes) // (4 * B * itemsize)
        tk = max(128, (max_tk // 128) * 128)
    if tk >= D:
        tk = D
    # (B, tk) block: B equals the full batch dim, tk is either D or a
    # multiple of 128, satisfying the (8, 128) block-shape rule.

    num_k = pl.cdiv(D, tk)
    needs_mask = (D % tk) != 0  # static: only emit masking ops if required

    def _kernel(ys_ref, yt_ref, o_ref, gs_ref, gt_ref):
        k = pl.program_id(0)

        @pl.when(k == 0)
        def _init():
            gs_ref[...] = jnp.zeros_like(gs_ref)
            gt_ref[...] = jnp.zeros_like(gt_ref)

        ys = ys_ref[...]  # (B, tk), native dtype -> MXU operand
        yt = yt_ref[...]

        if needs_mask:
            # Last block extends past D; OOB columns hold undefined data.
            # Cheap compare+select (no-op on non-final steps).
            col = jax.lax.broadcasted_iota(jnp.int32, (B, tk), 1)
            valid = (col + k * tk) < D
            ys = jnp.where(valid, ys, jnp.zeros_like(ys))
            yt = jnp.where(valid, yt, jnp.zeros_like(yt))

        # x @ x.T without materializing a transpose: contract the last dims.
        dn = (((1,), (1,)), ((), ()))
        gs_ref[...] += jax.lax.dot_general(ys, ys, dn,
                                           preferred_element_type=jnp.float32)
        gt_ref[...] += jax.lax.dot_general(yt, yt, dn,
                                           preferred_element_type=jnp.float32)

        @pl.when(k == pl.num_programs(0) - 1)
        def _finalize():
            gs = gs_ref[...]
            gt = gt_ref[...]
            # Row norms straight off the gram diagonal (no per-step sum-of-
            # squares path): ||x_i||^2 == G[i, i].
            row = jax.lax.broadcasted_iota(jnp.int32, (B, B), 0)
            col = jax.lax.broadcasted_iota(jnp.int32, (B, B), 1)
            eye = row == col
            zero = jnp.zeros((B, B), jnp.float32)
            ss = jnp.sum(jnp.where(eye, gs, zero), axis=1, keepdims=True)
            st = jnp.sum(jnp.where(eye, gt, zero), axis=1, keepdims=True)
            # F.normalize: x / max(||x||, eps), eps=1e-12
            #   <=> scale by rsqrt(max(||x||^2, eps^2)).
            eps2 = jnp.float32(1e-24)
            inv_s = jax.lax.rsqrt(jnp.maximum(ss, eps2))  # (B, 1)
            inv_t = jax.lax.rsqrt(jnp.maximum(st, eps2))
            gs_hat = gs * (inv_s * jnp.transpose(inv_s))  # outer rescale
            gt_hat = gt * (inv_t * jnp.transpose(inv_t))
            diff = gs_hat - gt_hat
            o_ref[0, 0] = jnp.sum(diff * diff) * jnp.float32(1.0 / (B * B))

    # Scoped VMEM limit: cover the actual footprint with margin, stay under
    # the generation budget (v7x 64 MiB physical vs 128 MiB on v5e/v6e).
    est = 2 * 2 * B * tk * itemsize + gram_bytes + (1 << 20)
    vmem_limit = int(min(max(2 * est, 16 * 1024 * 1024), budget))

    out = pl.pallas_call(
        _kernel,
        out_shape=jax.ShapeDtypeStruct((1, 1), jnp.float32),
        grid_spec=pltpu.PrefetchScalarGridSpec(
            num_scalar_prefetch=0,
            grid=(num_k,),
            in_specs=[
                pl.BlockSpec((B, tk), lambda k: (0, k)),
                pl.BlockSpec((B, tk), lambda k: (0, k)),
            ],
            out_specs=pl.BlockSpec((1, 1), lambda k: (0, 0),
                                   memory_space=pltpu.SMEM),
            scratch_shapes=[
                pltpu.VMEM((B, B), jnp.float32),  # student gram accumulator
                pltpu.VMEM((B, B), jnp.float32),  # teacher gram accumulator
            ],
        ),
        compiler_params=pltpu.CompilerParams(
            dimension_semantics=("arbitrary",),
            vmem_limit_bytes=vmem_limit,
        ),
    )(y_s, y_t)
    return out[0, 0]


def _reference(y_s, y_t):
    eps = 1e-12
    ys = y_s / jnp.maximum(jnp.linalg.norm(y_s, axis=1, keepdims=True), eps)
    yt = y_t / jnp.maximum(jnp.linalg.norm(y_t, axis=1, keepdims=True), eps)
    s = ys @ ys.T
    t = yt @ yt.T
    return jnp.mean((s - t) ** 2)


if __name__ == "__main__":
    key = jax.random.PRNGKey(0)

    # Small shape consistent with the module: batch of 8 feature vectors, D=32.
    k_s, k_t = jax.random.split(key)
    B, D = 8, 32
    y_s = jax.random.normal(k_s, (B, D), dtype=jnp.float32)
    y_t = jax.random.normal(k_t, (B, D), dtype=jnp.float32)

    loss = jax.block_until_ready(sim_based_loss(y_s, y_t))
    ref = jax.block_until_ready(_reference(y_s, y_t))
    assert jnp.allclose(loss, ref, rtol=2e-5, atol=1e-6), (loss, ref)

    # Also exercise the multi-step grid + in-kernel tail-mask path
    # (D=1200, tk=512 -> 3 K-steps, last block masked past column 1200).
    k_s2, k_t2 = jax.random.split(jax.random.PRNGKey(1))
    B2, D2 = 16, 1200
    y_s2 = jax.random.normal(k_s2, (B2, D2), dtype=jnp.float32)
    y_t2 = jax.random.normal(k_t2, (B2, D2), dtype=jnp.float32)

    loss2 = jax.block_until_ready(sim_based_loss(y_s2, y_t2, block_k=512))
    ref2 = jax.block_until_ready(_reference(y_s2, y_t2))
    assert jnp.allclose(loss2, ref2, rtol=2e-5, atol=1e-6), (loss2, ref2)

    # And the default (auto whole-D, single-step) path for the same inputs.
    loss3 = jax.block_until_ready(sim_based_loss(y_s2, y_t2))
    assert jnp.allclose(loss3, ref2, rtol=2e-5, atol=1e-6), (loss3, ref2)

    print("KERNEL_OK")
</pallas_src>

<mosaic_0001>
module attributes {stable_mosaic.version = 11 : i64} {
  func.func @_kernel(%arg0: i32, %arg1: memref<8x32xf32, #tpu.memory_space<vmem>>, %arg2: memref<8x32xf32, #tpu.memory_space<vmem>>, %arg3: memref<1x1xf32, #tpu.memory_space<smem>>, %arg4: memref<8x8xf32, #tpu.memory_space<vmem>>, %arg5: memref<8x8xf32, #tpu.memory_space<vmem>>) attributes {dimension_semantics = [#tpu.dimension_semantics<arbitrary>], iteration_bounds = array<i64: 1>, scalar_prefetch = 0 : i64, scratch_operands = 2 : i64, tpu.core_type = #tpu.core_type<tc>, window_params = [{transform_indices = @transform_0, window_bounds = array<i64: 8, 32>}, {transform_indices = @transform_1, window_bounds = array<i64: 8, 32>}, {transform_indices = @transform_2, window_bounds = array<i64: 1, 1>}]} {
    %c0_i32 = arith.constant 0 : i32
    %0 = arith.cmpi eq, %arg0, %c0_i32 : i32
    %1 = arith.extui %0 : i1 to i32
    %c0_i32_0 = arith.constant 0 : i32
    %2 = arith.cmpi ne, %1, %c0_i32_0 : i32
    scf.if %2 {
      %cst_15 = arith.constant 0.000000e+00 : f32
      %16 = vector.broadcast %cst_15 : f32 to vector<8x8xf32>
      %c0_16 = arith.constant 0 : index
      %c0_17 = arith.constant 0 : index
      %17 = vector.load %arg4[%c0_16, %c0_17] : memref<8x8xf32, #tpu.memory_space<vmem>>, vector<8x8xf32>
      tpu.vector_store %arg4[%c0_16, %c0_17], %16 {strides = array<i32>} : memref<8x8xf32, #tpu.memory_space<vmem>>, vector<8x8xf32>,
      %cst_18 = arith.constant 0.000000e+00 : f32
      %18 = vector.broadcast %cst_18 : f32 to vector<8x8xf32>
      %c0_19 = arith.constant 0 : index
      %c0_20 = arith.constant 0 : index
      %19 = vector.load %arg5[%c0_19, %c0_20] : memref<8x8xf32, #tpu.memory_space<vmem>>, vector<8x8xf32>
      tpu.vector_store %arg5[%c0_19, %c0_20], %18 {strides = array<i32>} : memref<8x8xf32, #tpu.memory_space<vmem>>, vector<8x8xf32>,
    } else {
    }
    %c0 = arith.constant 0 : index
    %c0_1 = arith.constant 0 : index
    %3 = vector.load %arg1[%c0, %c0_1] : memref<8x32xf32, #tpu.memory_space<vmem>>, vector<8x32xf32>
    %c0_2 = arith.constant 0 : index
    %c0_3 = arith.constant 0 : index
    %4 = vector.load %arg2[%c0_2, %c0_3] : memref<8x32xf32, #tpu.memory_space<vmem>>, vector<8x32xf32>
    %c0_4 = arith.constant 0 : index
    %c0_5 = arith.constant 0 : index
    %5 = vector.load %arg4[%c0_4, %c0_5] : memref<8x8xf32, #tpu.memory_space<vmem>>, vector<8x8xf32>
    %cst = arith.constant dense<0.000000e+00> : vector<8x8xf32>
    %6 = tpu.matmul %3, %3, %cst {dimension_numbers = #tpu.dot_dimension_numbers<[1], [1], [0], [0], [0, 0, 1, 0], [], []>} : vector<8x32xf32>, vector<8x32xf32>, vector<8x8xf32> -> vector<8x8xf32>
    %7 = arith.addf %5, %6 : vector<8x8xf32>
    %c0_6 = arith.constant 0 : index
    %c0_7 = arith.constant 0 : index
    %8 = vector.load %arg4[%c0_6, %c0_7] : memref<8x8xf32, #tpu.memory_space<vmem>>, vector<8x8xf32>
    tpu.vector_store %arg4[%c0_6, %c0_7], %7 {strides = array<i32>} : memref<8x8xf32, #tpu.memory_space<vmem>>, vector<8x8xf32>,
    %c0_8 = arith.constant 0 : index
    %c0_9 = arith.constant 0 : index
    %9 = vector.load %arg5[%c0_8, %c0_9] : memref<8x8xf32, #tpu.memory_space<vmem>>, vector<8x8xf32>
    %cst_10 = arith.constant dense<0.000000e+00> : vector<8x8xf32>
    %10 = tpu.matmul %4, %4, %cst_10 {dimension_numbers = #tpu.dot_dimension_numbers<[1], [1], [0], [0], [0, 0, 1, 0], [], []>} : vector<8x32xf32>, vector<8x32xf32>, vector<8x8xf32> -> vector<8x8xf32>
    %11 = arith.addf %9, %10 : vector<8x8xf32>
    %c0_11 = arith.constant 0 : index
    %c0_12 = arith.constant 0 : index
    %12 = vector.load %arg5[%c0_11, %c0_12] : memref<8x8xf32, #tpu.memory_space<vmem>>, vector<8x8xf32>
    tpu.vector_store %arg5[%c0_11, %c0_12], %11 {strides = array<i32>} : memref<8x8xf32, #tpu.memory_space<vmem>>, vector<8x8xf32>,
    %c0_i32_13 = arith.constant 0 : i32
    %13 = arith.cmpi eq, %arg0, %c0_i32_13 : i32
    %14 = arith.extui %13 : i1 to i32
    %c0_i32_14 = arith.constant 0 : i32
    %15 = arith.cmpi ne, %14, %c0_i32_14 : i32
    scf.if %15 {
      %c0_15 = arith.constant 0 : index
      %c0_16 = arith.constant 0 : index
      %16 = vector.load %arg4[%c0_15, %c0_16] : memref<8x8xf32, #tpu.memory_space<vmem>>, vector<8x8xf32>
      %c0_17 = arith.constant 0 : index
      %c0_18 = arith.constant 0 : index
      %17 = vector.load %arg5[%c0_17, %c0_18] : memref<8x8xf32, #tpu.memory_space<vmem>>, vector<8x8xf32>
      %18 = tpu.iota {dimensions = array<i32: 0>} : vector<8x8xi32>
      %19 = tpu.iota {dimensions = array<i32: 1>} : vector<8x8xi32>
      %20 = arith.cmpi eq, %18, %19 : vector<8x8xi32>
      %cst_19 = arith.constant 0.000000e+00 : f32
      %21 = vector.broadcast %cst_19 : f32 to vector<8x8xf32>
      %22 = arith.select %20, %16, %21 : vector<8x8xi1>, vector<8x8xf32>
      %cst_20 = arith.constant dense<0.000000e+00> : vector<8xf32>
      %23 = vector.multi_reduction <add>, %22, %cst_20 [1] : vector<8x8xf32> to vector<8xf32>
      %24 = vector.shape_cast %23 : vector<8xf32> to vector<8x1xf32>
      %25 = arith.select %20, %17, %21 : vector<8x8xi1>, vector<8x8xf32>
      %cst_21 = arith.constant dense<0.000000e+00> : vector<8xf32>
      %26 = vector.multi_reduction <add>, %25, %cst_21 [1] : vector<8x8xf32> to vector<8xf32>
      %27 = vector.shape_cast %26 : vector<8xf32> to vector<8x1xf32>
      %cst_22 = arith.constant 1.000000e-24 : f32
      %28 = vector.broadcast %cst_22 : f32 to vector<8x1xf32>
      %29 = arith.maximumf %24, %28 : vector<8x1xf32>
      %30 = math.rsqrt %29 : vector<8x1xf32>
      %cst_23 = arith.constant 1.000000e-24 : f32
      %31 = vector.broadcast %cst_23 : f32 to vector<8x1xf32>
      %32 = arith.maximumf %27, %31 : vector<8x1xf32>
      %33 = math.rsqrt %32 : vector<8x1xf32>
      %34 = tpu.transpose %30, [1, 0] : vector<8x1xf32> -> vector<1x8xf32>
      %35 = vector.broadcast %30 : vector<8x1xf32> to vector<8x8xf32>
      %36 = vector.broadcast %34 : vector<1x8xf32> to vector<8x8xf32>
      %37 = arith.mulf %35, %36 : vector<8x8xf32>
      %38 = arith.mulf %16, %37 : vector<8x8xf32>
      %39 = tpu.transpose %33, [1, 0] : vector<8x1xf32> -> vector<1x8xf32>
      %40 = vector.broadcast %33 : vector<8x1xf32> to vector<8x8xf32>
      %41 = vector.broadcast %39 : vector<1x8xf32> to vector<8x8xf32>
      %42 = arith.mulf %40, %41 : vector<8x8xf32>
      %43 = arith.mulf %17, %42 : vector<8x8xf32>
      %44 = arith.subf %38, %43 : vector<8x8xf32>
      %45 = arith.mulf %44, %44 : vector<8x8xf32>
      %46 = vector.shape_cast %45 : vector<8x8xf32> to vector<1x8x8xf32>
      %cst_24 = arith.constant dense<0.000000e+00> : vector<1xf32>
      %47 = vector.multi_reduction <add>, %46, %cst_24 [1, 2] : vector<1x8x8xf32> to vector<1xf32>
      %48 = vector.shape_cast %47 : vector<1xf32> to vector<1x1x1xf32>
      %49 = vector.extract %48[0, 0, 0] : f32 from vector<1x1x1xf32>
      %cst_25 = arith.constant 1.562500e-02 : f32
      %50 = arith.mulf %49, %cst_25 : f32
      %c0_26 = arith.constant 0 : index
      %c0_27 = arith.constant 0 : index
      %51 = memref.load %arg3[%c0_26, %c0_27] : memref<1x1xf32, #tpu.memory_space<smem>>
      memref.store %50, %arg3[%c0_26, %c0_27] : memref<1x1xf32, #tpu.memory_space<smem>>
    } else {
    }
    return
  }
  func.func @transform_0(%arg0: i32) -> (i32, i32) {
    %c0_i32 = arith.constant 0 : i32
    %c0_i32_0 = arith.constant 0 : i32
    return %c0_i32, %arg0 : i32, i32
  }
  func.func @transform_1(%arg0: i32) -> (i32, i32) {
    %c0_i32 = arith.constant 0 : i32
    %c0_i32_0 = arith.constant 0 : i32
    return %c0_i32, %arg0 : i32, i32
  }
  func.func @transform_2(%arg0: i32) -> (i32, i32) {
    %c0_i32 = arith.constant 0 : i32
    %c0_i32_0 = arith.constant 0 : i32
    %c0_i32_1 = arith.constant 0 : i32
    return %c0_i32, %c0_i32_0 : i32, i32
  }
}

</mosaic_0001>

<bundles_post_ra>
// kernel: tpu_custom_call.1
= control target key start
LH: loop header
LB: loop body
LE: loop exit
PB: predicated region body
PF: predicated region fallthrough
CT: control target
= control target key end

     0   :  { %7 = vsyncpa [#allocation5], 0  ;;  %s360_s0 = inlined_call_operand.hbm [shape: f32[8,32], index: 0, kind: input, shape index: {}]   ;;  %s361_s1 = inlined_call_operand.hbm [shape: f32[8,32], index: 1, kind: input, shape index: {}]   ;;  %s362_s2 = inlined_call_operand.hbm [shape: f32[1,1], index: 2, kind: output, shape index: {}]  }
   0x1   :  { %8 = vsyncpa [#allocation8], 0 }
   0x2   :  { %9 = vsyncpa [#allocation6], 0  ;;  %s15_s11 = sshll.u32 %s360_s0, 4  ;;  %s325_s12 = smov [#allocation4]   ;;  %s16_s11 = int_to_ptr.hbm [resolvable:$true] %s15_s11 }
   0x3   :  { %s17_s13 = sshll.u32 %s325_s12, 4  ;;  %s26_s16 = sshll.u32 %s361_s1, 4  ;;  %s18_s13 = int_to_ptr.vmem [resolvable:$true] %s17_s13  ;;  %s27_s16 = int_to_ptr.hbm [resolvable:$true] %s26_s16 }
   0x4   :  { %20 = dma.hbm_to_vmem [thread:$0]  %s16_s11, 128, %s18_s13, [#allocation5]  }
   0x5   :  { %s326_s17 = smov [#allocation7]  }
   0x6   :  { %s28_s18 = sshll.u32 %s326_s17, 4  ;;  %s29_s18 = int_to_ptr.vmem [resolvable:$true] %s28_s18 }
   0x7   :  { %31 = dma.hbm_to_vmem [thread:$0]  %s27_s16, 128, %s29_s18, [#allocation8]  }
   0x8   :  { %319 = dma.done.wait [#allocation5], 128  }
   0x9   :  { %320 = vsyncadd [#allocation5], 4294967168 }
   0xa   :  { %321 = dma.done.wait [#allocation8], 128  }
   0xb   :  { %322 = vsyncadd [#allocation8], 4294967168  ;;  %vm44_vm0 = vcmask 64512   ;;  %v327_v0 = vmov 0.0   ;;  %vm50_vm1 = vcmask 261120   ;;  %v47_v1 = vld [vmem:[#allocation4] sm:$0xff]  ;;  %v108_v7 = vlaneseq }
   0xc   :  { %45 = vst.msk [vmem:[#allocation2] sm:$0xff] %vm44_vm0, %v327_v0  ;;  %v48_v2 = vld [vmem:[#allocation7] sm:$0xff]  ;;  %245 = vmatpush.xpose.msk.msra.mxu0 %vm50_vm1, %v47_v1  ;;  %s233_s19 = sshll.u32 %s362_s2, 4  ;;  %s328_s22 = smov [#allocation9]   ;;  %s234_s19 = int_to_ptr.hbm [resolvable:$true] %s233_s19 }
   0xd   :  { %46 = vst.msk [vmem:[#allocation3] sm:$0xff] %vm44_vm0, %v327_v0  ;;  %247 = vmatpush.xpose.msk.msra.mxu1 %vm50_vm1, %v48_v2  ;;  %v109_v10 = vshrl.u32 %v108_v7, 7  ;;  %v111_v11 = vand.u32 127, %v108_v7 }
   0xf   :  { %246 = vmatmul.msk.f32.vlgmr.msra.gmra.mxu0 %vm50_vm1, %v47_v1  ;;  %vm112_vm2 = vcmp.eq.s32.totalorder %v109_v10, %v111_v11 }
  0x10   :  { %248 = vmatmul.msk.f32.vlgmr.msra.gmra.mxu1 %vm50_vm1, %v48_v2 }
  0x13   :  { %v49_v3 = vld [vmem:[#allocation2] sm:$0xff] }
  0x14   :  { %v77_v4 = vld [vmem:[#allocation3] sm:$0xff] }
  0x8c   :  { %v71_v5 = vpop.f32.mrf.mxu0 }
  0x8d   :  { %v98_v6 = vpop.f32.mrf.mxu1  ;;  %v74_v8 = vadd.f32 %v71_v5, %v49_v3 }
  0x8e   :  { %v101_v9 = vadd.f32 %v98_v6, %v77_v4 }
  0x8f   :  { %76 = vst.msk [vmem:[#allocation2] sm:$0xff] %vm44_vm0, %v74_v8 }
  0x90   :  { %102 = vst.msk [vmem:[#allocation3] sm:$0xff] %vm44_vm0, %v101_v9 }
  0x96   :  { %v106_v12 = vld [vmem:[#allocation2] sm:$0xff] }
  0x97   :  { %v113_v13 = vsel %vm112_vm2, %v106_v12, 0.0  ;;  %v107_v15 = vld [vmem:[#allocation3] sm:$0xff] }
  0x98   :  { %v114_v14 = vsel %vm44_vm0, %v113_v13, 0.0  ;;  %v117_v16 = vsel %vm112_vm2, %v107_v15, 0.0 }
  0x99   :  { %115 = vadd.xlane.f32.xlu0 %v114_v14  ;;  %v118_v17 = vsel %vm44_vm0, %v117_v16, 0.0 }
  0xa1   :  { %119 = vadd.xlane.f32.xlu0 %v118_v17 }
 0x10c   :  { %v116_v18 = vpop.xlane.xlu0 %115 }
 0x10d   :  { %v121_v19 = vmax.f32 %v116_v18, 1e-24 }
 0x10f   :  { %255 = vrsqrt.f32 %v121_v19  ;;  %vm128_vm4 = vweird.f32 %v121_v19 }
 0x114   :  { %v120_v20 = vpop.xlane.xlu0 %119 }
 0x115   :  { %v256_v21 = vpop.eup %255  ;;  %v132_v22 = vmax.f32 %v120_v20, 1e-24 }
 0x116   :  { %v123_v23 = vmul.f32 %v256_v21, %v121_v19  ;;  %vm129_vm3 = vweird.f32 %v256_v21 }
 0x117   :  { %257 = vrsqrt.f32 %v132_v22  ;;  %vm130_vm5 = vmor %vm128_vm4, %vm129_vm3  ;;  %vm139_vm7 = vweird.f32 %v132_v22 }
 0x118   :  { %v124_v24 = vmul.f32 %v256_v21, %v123_v23 }
 0x11a   :  { %v125_v25 = vmul.f32 0.5, %v124_v24 }
 0x11c   :  { %v126_v26 = vsub.f32 1.5, %v125_v25 }
 0x11d   :  { %v258_v27 = vpop.eup %257 }
 0x11e   :  { %v134_v28 = vmul.f32 %v258_v27, %v132_v22  ;;  %v127_v29 = vmul.f32 %v256_v21, %v126_v26  ;;  %vm140_vm6 = vweird.f32 %v258_v27 }
 0x11f   :  { %vm141_vm8 = vmor %vm139_vm7, %vm140_vm6 }
 0x120   :  { %v135_v30 = vmul.f32 %v258_v27, %v134_v28  ;;  %v131_v31 = vsel %vm130_vm5, %v256_v21, %v127_v29 }
 0x121   :  { %143 = vxpose.xlu1.b32.start.end [1/1] (short) (narrow) %v131_v31, 8 }
 0x122   :  { %v136_v32 = vmul.f32 0.5, %v135_v30 }
 0x124   :  { %v137_v33 = vsub.f32 1.5, %v136_v32 }
 0x126   :  { %v138_v34 = vmul.f32 %v258_v27, %v137_v33 }
 0x128   :  { %v142_v35 = vsel %vm141_vm8, %v258_v27, %v138_v34 }
 0x129   :  { %178 = vxpose.xlu1.b32.start.end [1/1] (short) (narrow) %v142_v35, 8 }
 0x1c5   :  { %v159_v36 = vpop.trf.xlu1 }
 0x1c6   :  { %v175_v37 = vperm.slane %v159_v36, 0 }
 0x1c8   :  { %v176_v39 = vmul.f32 %v175_v37, %v131_v31 }
 0x1ca   :  { %v177_v43 = vmul.f32 %v176_v39, %v106_v12 }
 0x1cd   :  { %v194_v38 = vpop.trf.xlu1 }
 0x1ce   :  { %v210_v40 = vperm.slane %v194_v38, 0 }
 0x1d0   :  { %v211_v41 = vmul.f32 %v210_v40, %v142_v35 }
 0x1d2   :  { %v212_v42 = vmul.f32 %v211_v41, %v107_v15 }
 0x1d4   :  { %v213_v44 = vsub.f32 %v177_v43, %v212_v42 }
 0x1d6   :  { %v214_v45 = vmul.f32 %v213_v44, %v213_v44 }
 0x1d8   :  { %v215_v46 = vsel %vm44_vm0, %v214_v45, 0.0 }
 0x1d9   :  { %216 = vadd.xlane.f32.xlu2 %v215_v46 }
 0x24c   :  { %v217_v47 = vpop.xlane.xlu2 %216 }
 0x24d   :  { %v218_v48 = vrot.slane %v217_v47, 4 }
 0x24f   :  { %v219_v49 = vadd.f32 %v218_v48, %v217_v47 }
 0x251   :  { %v220_v50 = vrot.slane %v219_v49, 2 }
 0x253   :  { %v221_v51 = vadd.f32 %v220_v50, %v219_v49 }
 0x255   :  { %v222_v52 = vrot.slane %v221_v51, 1 }
 0x257   :  { %v223_v53 = vadd.f32 %v222_v52, %v221_v51 }
 0x259   :  { %249 = vpush %v223_v53 }
 0x28a   :  { %s250_s20 = spop %249 }
 0x28b   :  { %s225_s21 = smul.f32 0.015625, %s250_s20 }
 0x28d   :  { %227 = sst [smem:[#allocation9]] %s225_s21 }
 0x28e   :  { %236 = dma.smem_to_hbm %s328_s22, 16, %s234_s19, [#allocation6]  }
 0x28f   :  { %323 = dma.done.wait [#allocation6], 16  }
 0x290   :  { %324 = vsyncadd [#allocation6], 4294967280 }
 0x291   :  { %241 = sfence }
 0x292   :  { %242 = vsyncpa [#allocation5], 1 }
 0x293   :  { %243 = vsyncpa [#allocation8], 1 }
 0x294   :  { %244 = vsyncpa [#allocation6], 1 }

</bundles_post_ra>
